<compile_context>
chip_gen: v5e
topology: v5e:2x2
jax: 0.10.0
libtpu: 0.0.40
codegen_flags: <defaults>
</compile_context>

<pallas_src>
import jax
import jax.numpy as jnp
from jax.experimental import pallas as pl
from jax.experimental.pallas import tpu as pltpu

LANES = 128
NUM_SLICES = 2  # v7x: one per TensorCore; v5e/v6e: two serial outer iterations.


def _make_kernel(n_valid, row_block, blocks_per_slice):
    elems_per_block = row_block * LANES

    def kernel(o_ref, t_ref, part_ref):
        c = pl.program_id(0)   # "parallel" slice (TensorCore on v7x)
        i = pl.program_id(1)   # "arbitrary" reduction step within the slice

        @pl.when(i == 0)
        def _():
            part_ref[...] = jnp.zeros_like(part_ref)

        # Intended (unclamped) block id -> global element range of this tile.
        b = c * blocks_per_slice + i
        block_start = b * elems_per_block
        block_end = block_start + elems_per_block

        def accumulate(of, tf):
            # Keep 128 lane-parallel partial sums; no cross-lane reduce here.
            part_ref[0, 0:1, :] += jnp.sum(of * tf, axis=0, keepdims=True)
            part_ref[0, 1:2, :] += jnp.sum(of + tf, axis=0, keepdims=True)

        # Fast path: tile lies fully inside the valid data -> no masking work.
        @pl.when(block_end <= n_valid)
        def _():
            accumulate(o_ref[...].astype(jnp.float32),
                       t_ref[...].astype(jnp.float32))

        # Boundary tile: mask out elements past the true element count.
        @pl.when(jnp.logical_and(block_start < n_valid, block_end > n_valid))
        def _():
            row_ids = jax.lax.broadcasted_iota(jnp.int32, (row_block, LANES), 0)
            lane_ids = jax.lax.broadcasted_iota(jnp.int32, (row_block, LANES), 1)
            idx = block_start + row_ids * LANES + lane_ids
            mask = idx < n_valid
            of = jnp.where(mask, o_ref[...].astype(jnp.float32), 0.0)
            tf = jnp.where(mask, t_ref[...].astype(jnp.float32), 0.0)
            accumulate(of, tf)

        # Tiles entirely past n_valid (clamped duplicates) contribute nothing.

    return kernel


def dice_loss(output, target, smooth=0.0, eps=1e-7, *, row_block=2048):
    assert output.shape == target.shape
    assert row_block % 8 == 0

    # Keep native dtypes; flatten is a free (row-major) reshape.
    o_flat = jnp.ravel(output)
    t_flat = jnp.ravel(target)
    n = o_flat.shape[0]

    # Pad only up to the next lane boundary (<=127 elements).  For the common
    # case n % 128 == 0 this is a no-op and nothing is copied.
    lane_pad = (-n) % LANES
    if lane_pad:
        o_flat = jnp.pad(o_flat, (0, lane_pad))
        t_flat = jnp.pad(t_flat, (0, lane_pad))
    rows = (n + lane_pad) // LANES
    o2d = o_flat.reshape(rows, LANES)
    t2d = t_flat.reshape(rows, LANES)

    if rows <= row_block:
        row_block = rows  # single tile == full array extent (always legal)

    total_blocks = pl.cdiv(rows, row_block)
    blocks_per_slice = pl.cdiv(total_blocks, NUM_SLICES)

    def in_map(c, i):
        b = c * blocks_per_slice + i
        # Clamp overshoot blocks (they are fully masked out in the kernel).
        return (jnp.minimum(b, total_blocks - 1), 0)

    parts = pl.pallas_call(
        _make_kernel(n, row_block, blocks_per_slice),
        out_shape=jax.ShapeDtypeStruct((NUM_SLICES, 2, LANES), jnp.float32),
        grid_spec=pltpu.PrefetchScalarGridSpec(
            num_scalar_prefetch=0,
            grid=(NUM_SLICES, blocks_per_slice),
            in_specs=[
                pl.BlockSpec((row_block, LANES), in_map),
                pl.BlockSpec((row_block, LANES), in_map),
            ],
            out_specs=pl.BlockSpec((1, 2, LANES), lambda c, i: (c, 0, 0)),
        ),
        compiler_params=pltpu.CompilerParams(
            dimension_semantics=("parallel", "arbitrary"),
        ),
    )(o2d, t2d)

    # Tiny epilogue in plain JAX: cross-lane + cross-slice reduce and division.
    inter = jnp.sum(parts[:, 0, :], dtype=jnp.float32)
    den = jnp.sum(parts[:, 1, :], dtype=jnp.float32)
    smooth = jnp.float32(smooth)
    eps = jnp.float32(eps)
    return jnp.float32(1.0) - (jnp.float32(2.0) * inter + smooth) / (den + smooth + eps)


def dice_loss_ref(output, target, smooth=0.0, eps=1e-7):
    o = output.astype(jnp.float32)
    t = target.astype(jnp.float32)
    return 1.0 - (2.0 * jnp.sum(o * t) + smooth) / (jnp.sum(o) + jnp.sum(t) + smooth + eps)


if __name__ == "__main__":
    key = jax.random.PRNGKey(0)
    k1, k2, k3, k4 = jax.random.split(key, 4)

    # Main test: segmentation-style NCHW input, lane-aligned (no pad copy).
    x_shape = (2, 4, 16, 16)
    output = jax.nn.sigmoid(jax.random.normal(k1, x_shape, dtype=jnp.float32))
    target = (jax.random.uniform(k2, x_shape) > 0.5).astype(jnp.float32)

    loss = jax.block_until_ready(dice_loss(output, target, smooth=0.0, eps=1e-7))
    ref = dice_loss_ref(output, target, smooth=0.0, eps=1e-7)
    assert jnp.allclose(loss, ref, rtol=1e-5, atol=1e-6), (loss, ref)

    # Ragged test: exercises the in-kernel tail mask (element count % 128 != 0).
    y_shape = (2, 3, 7, 11)
    output2 = jax.nn.sigmoid(jax.random.normal(k3, y_shape, dtype=jnp.float32))
    target2 = (jax.random.uniform(k4, y_shape) > 0.5).astype(jnp.float32)
    loss2 = jax.block_until_ready(dice_loss(output2, target2, smooth=1.0, eps=1e-7))
    ref2 = dice_loss_ref(output2, target2, smooth=1.0, eps=1e-7)
    assert jnp.allclose(loss2, ref2, rtol=1e-5, atol=1e-6), (loss2, ref2)

    print("KERNEL_OK")
</pallas_src>

<mosaic_0001>
module attributes {stable_mosaic.version = 11 : i64} {
  func.func @kernel(%arg0: i32, %arg1: i32, %arg2: memref<16x128xf32, #tpu.memory_space<vmem>>, %arg3: memref<16x128xf32, #tpu.memory_space<vmem>>, %arg4: memref<1x2x128xf32, #tpu.memory_space<vmem>>) attributes {dimension_semantics = [#tpu.dimension_semantics<parallel>, #tpu.dimension_semantics<arbitrary>], iteration_bounds = array<i64: 2, 1>, scalar_prefetch = 0 : i64, scratch_operands = 0 : i64, tpu.core_type = #tpu.core_type<tc>, window_params = [{transform_indices = @transform_0, window_bounds = array<i64: 16, 128>}, {transform_indices = @transform_1, window_bounds = array<i64: 16, 128>}, {transform_indices = @transform_2, window_bounds = array<i64: 1, 2, 128>}]} {
    %c0_i32 = arith.constant 0 : i32
    %0 = arith.cmpi eq, %arg1, %c0_i32 : i32
    %1 = arith.extui %0 : i1 to i32
    %c0_i32_0 = arith.constant 0 : i32
    %2 = arith.cmpi ne, %1, %c0_i32_0 : i32
    scf.if %2 {
      %cst = arith.constant 0.000000e+00 : f32
      %15 = vector.broadcast %cst : f32 to vector<1x2x128xf32>
      %c0 = arith.constant 0 : index
      %c0_7 = arith.constant 0 : index
      %c0_8 = arith.constant 0 : index
      %16 = vector.load %arg4[%c0, %c0_7, %c0_8] : memref<1x2x128xf32, #tpu.memory_space<vmem>>, vector<1x2x128xf32>
      tpu.vector_store %arg4[%c0, %c0_7, %c0_8], %15 {strides = array<i32>} : memref<1x2x128xf32, #tpu.memory_space<vmem>>, vector<1x2x128xf32>,
    } else {
    }
    %c1_i32 = arith.constant 1 : i32
    %3 = arith.muli %arg0, %c1_i32 : i32
    %4 = arith.addi %3, %arg1 : i32
    %c2048_i32 = arith.constant 2048 : i32
    %5 = arith.muli %4, %c2048_i32 : i32
    %c2048_i32_1 = arith.constant 2048 : i32
    %6 = arith.addi %5, %c2048_i32_1 : i32
    %c2048_i32_2 = arith.constant 2048 : i32
    %7 = arith.cmpi sle, %6, %c2048_i32_2 : i32
    %8 = arith.extui %7 : i1 to i32
    %c0_i32_3 = arith.constant 0 : i32
    %9 = arith.cmpi ne, %8, %c0_i32_3 : i32
    scf.if %9 {
      %c0 = arith.constant 0 : index
      %c0_7 = arith.constant 0 : index
      %15 = vector.load %arg2[%c0, %c0_7] : memref<16x128xf32, #tpu.memory_space<vmem>>, vector<16x128xf32>
      %c0_8 = arith.constant 0 : index
      %c0_9 = arith.constant 0 : index
      %16 = vector.load %arg3[%c0_8, %c0_9] : memref<16x128xf32, #tpu.memory_space<vmem>>, vector<16x128xf32>
      %c0_10 = arith.constant 0 : index
      %c0_11 = arith.constant 0 : index
      %c0_12 = arith.constant 0 : index
      %17 = vector.load %arg4[%c0_10, %c0_11, %c0_12] : memref<1x2x128xf32, #tpu.memory_space<vmem>>, vector<1x1x128xf32>
      %18 = vector.shape_cast %17 : vector<1x1x128xf32> to vector<1x128xf32>
      %19 = arith.mulf %15, %16 : vector<16x128xf32>
      %cst = arith.constant dense<0.000000e+00> : vector<128xf32>
      %20 = vector.multi_reduction <add>, %19, %cst [0] : vector<16x128xf32> to vector<128xf32>
      %21 = vector.shape_cast %20 : vector<128xf32> to vector<1x128xf32>
      %22 = arith.addf %18, %21 : vector<1x128xf32>
      %c0_13 = arith.constant 0 : index
      %c0_14 = arith.constant 0 : index
      %c0_15 = arith.constant 0 : index
      %23 = vector.load %arg4[%c0_13, %c0_14, %c0_15] : memref<1x2x128xf32, #tpu.memory_space<vmem>>, vector<1x1x128xf32>
      %24 = vector.shape_cast %23 : vector<1x1x128xf32> to vector<1x128xf32>
      %25 = vector.shape_cast %22 : vector<1x128xf32> to vector<1x1x128xf32>
      tpu.vector_store %arg4[%c0_13, %c0_14, %c0_15], %25 {strides = array<i32>} : memref<1x2x128xf32, #tpu.memory_space<vmem>>, vector<1x1x128xf32>,
      %c0_16 = arith.constant 0 : index
      %c1 = arith.constant 1 : index
      %c0_17 = arith.constant 0 : index
      %26 = vector.load %arg4[%c0_16, %c1, %c0_17] : memref<1x2x128xf32, #tpu.memory_space<vmem>>, vector<1x1x128xf32>
      %27 = vector.shape_cast %26 : vector<1x1x128xf32> to vector<1x128xf32>
      %28 = arith.addf %15, %16 : vector<16x128xf32>
      %cst_18 = arith.constant dense<0.000000e+00> : vector<128xf32>
      %29 = vector.multi_reduction <add>, %28, %cst_18 [0] : vector<16x128xf32> to vector<128xf32>
      %30 = vector.shape_cast %29 : vector<128xf32> to vector<1x128xf32>
      %31 = arith.addf %27, %30 : vector<1x128xf32>
      %c0_19 = arith.constant 0 : index
      %c1_20 = arith.constant 1 : index
      %c0_21 = arith.constant 0 : index
      %32 = vector.load %arg4[%c0_19, %c1_20, %c0_21] : memref<1x2x128xf32, #tpu.memory_space<vmem>>, vector<1x1x128xf32>
      %33 = vector.shape_cast %32 : vector<1x1x128xf32> to vector<1x128xf32>
      %34 = vector.shape_cast %31 : vector<1x128xf32> to vector<1x1x128xf32>
      tpu.vector_store %arg4[%c0_19, %c1_20, %c0_21], %34 {strides = array<i32>} : memref<1x2x128xf32, #tpu.memory_space<vmem>>, vector<1x1x128xf32>,
    } else {
    }
    %c2048_i32_4 = arith.constant 2048 : i32
    %10 = arith.cmpi slt, %5, %c2048_i32_4 : i32
    %c2048_i32_5 = arith.constant 2048 : i32
    %11 = arith.cmpi sgt, %6, %c2048_i32_5 : i32
    %12 = arith.andi %10, %11 : i1
    %13 = arith.extui %12 : i1 to i32
    %c0_i32_6 = arith.constant 0 : i32
    %14 = arith.cmpi ne, %13, %c0_i32_6 : i32
    scf.if %14 {
      %15 = tpu.iota {dimensions = array<i32: 0>} : vector<16x128xi32>
      %16 = tpu.iota {dimensions = array<i32: 1>} : vector<16x128xi32>
      %c128_i32 = arith.constant 128 : i32
      %17 = vector.broadcast %c128_i32 : i32 to vector<16x128xi32>
      %18 = arith.muli %15, %17 : vector<16x128xi32>
      %19 = vector.broadcast %5 : i32 to vector<16x128xi32>
      %20 = arith.addi %19, %18 : vector<16x128xi32>
      %21 = arith.addi %20, %16 : vector<16x128xi32>
      %c2048_i32_7 = arith.constant 2048 : i32
      %22 = vector.broadcast %c2048_i32_7 : i32 to vector<16x128xi32>
      %23 = arith.cmpi slt, %21, %22 : vector<16x128xi32>
      %c0 = arith.constant 0 : index
      %c0_8 = arith.constant 0 : index
      %24 = vector.load %arg2[%c0, %c0_8] : memref<16x128xf32, #tpu.memory_space<vmem>>, vector<16x128xf32>
      %cst = arith.constant 0.000000e+00 : f32
      %25 = vector.broadcast %cst : f32 to vector<16x128xf32>
      %26 = arith.select %23, %24, %25 : vector<16x128xi1>, vector<16x128xf32>
      %c0_9 = arith.constant 0 : index
      %c0_10 = arith.constant 0 : index
      %27 = vector.load %arg3[%c0_9, %c0_10] : memref<16x128xf32, #tpu.memory_space<vmem>>, vector<16x128xf32>
      %cst_11 = arith.constant 0.000000e+00 : f32
      %28 = vector.broadcast %cst_11 : f32 to vector<16x128xf32>
      %29 = arith.select %23, %27, %28 : vector<16x128xi1>, vector<16x128xf32>
      %c0_12 = arith.constant 0 : index
      %c0_13 = arith.constant 0 : index
      %c0_14 = arith.constant 0 : index
      %30 = vector.load %arg4[%c0_12, %c0_13, %c0_14] : memref<1x2x128xf32, #tpu.memory_space<vmem>>, vector<1x1x128xf32>
      %31 = vector.shape_cast %30 : vector<1x1x128xf32> to vector<1x128xf32>
      %32 = arith.mulf %26, %29 : vector<16x128xf32>
      %cst_15 = arith.constant dense<0.000000e+00> : vector<128xf32>
      %33 = vector.multi_reduction <add>, %32, %cst_15 [0] : vector<16x128xf32> to vector<128xf32>
      %34 = vector.shape_cast %33 : vector<128xf32> to vector<1x128xf32>
      %35 = arith.addf %31, %34 : vector<1x128xf32>
      %c0_16 = arith.constant 0 : index
      %c0_17 = arith.constant 0 : index
      %c0_18 = arith.constant 0 : index
      %36 = vector.load %arg4[%c0_16, %c0_17, %c0_18] : memref<1x2x128xf32, #tpu.memory_space<vmem>>, vector<1x1x128xf32>
      %37 = vector.shape_cast %36 : vector<1x1x128xf32> to vector<1x128xf32>
      %38 = vector.shape_cast %35 : vector<1x128xf32> to vector<1x1x128xf32>
      tpu.vector_store %arg4[%c0_16, %c0_17, %c0_18], %38 {strides = array<i32>} : memref<1x2x128xf32, #tpu.memory_space<vmem>>, vector<1x1x128xf32>,
      %c0_19 = arith.constant 0 : index
      %c1 = arith.constant 1 : index
      %c0_20 = arith.constant 0 : index
      %39 = vector.load %arg4[%c0_19, %c1, %c0_20] : memref<1x2x128xf32, #tpu.memory_space<vmem>>, vector<1x1x128xf32>
      %40 = vector.shape_cast %39 : vector<1x1x128xf32> to vector<1x128xf32>
      %41 = arith.addf %26, %29 : vector<16x128xf32>
      %cst_21 = arith.constant dense<0.000000e+00> : vector<128xf32>
      %42 = vector.multi_reduction <add>, %41, %cst_21 [0] : vector<16x128xf32> to vector<128xf32>
      %43 = vector.shape_cast %42 : vector<128xf32> to vector<1x128xf32>
      %44 = arith.addf %40, %43 : vector<1x128xf32>
      %c0_22 = arith.constant 0 : index
      %c1_23 = arith.constant 1 : index
      %c0_24 = arith.constant 0 : index
      %45 = vector.load %arg4[%c0_22, %c1_23, %c0_24] : memref<1x2x128xf32, #tpu.memory_space<vmem>>, vector<1x1x128xf32>
      %46 = vector.shape_cast %45 : vector<1x1x128xf32> to vector<1x128xf32>
      %47 = vector.shape_cast %44 : vector<1x128xf32> to vector<1x1x128xf32>
      tpu.vector_store %arg4[%c0_22, %c1_23, %c0_24], %47 {strides = array<i32>} : memref<1x2x128xf32, #tpu.memory_space<vmem>>, vector<1x1x128xf32>,
    } else {
    }
    return
  }
  func.func @transform_0(%arg0: i32, %arg1: i32) -> (i32, i32) {
    %c1_i32 = arith.constant 1 : i32
    %0 = arith.muli %arg0, %c1_i32 : i32
    %1 = arith.addi %0, %arg1 : i32
    %c0_i32 = arith.constant 0 : i32
    %2 = arith.minsi %1, %c0_i32 : i32
    %c0_i32_0 = arith.constant 0 : i32
    %c0_i32_1 = arith.constant 0 : i32
    return %2, %c0_i32_0 : i32, i32
  }
  func.func @transform_1(%arg0: i32, %arg1: i32) -> (i32, i32) {
    %c1_i32 = arith.constant 1 : i32
    %0 = arith.muli %arg0, %c1_i32 : i32
    %1 = arith.addi %0, %arg1 : i32
    %c0_i32 = arith.constant 0 : i32
    %2 = arith.minsi %1, %c0_i32 : i32
    %c0_i32_0 = arith.constant 0 : i32
    %c0_i32_1 = arith.constant 0 : i32
    return %2, %c0_i32_0 : i32, i32
  }
  func.func @transform_2(%arg0: i32, %arg1: i32) -> (i32, i32, i32) {
    %c0_i32 = arith.constant 0 : i32
    %c0_i32_0 = arith.constant 0 : i32
    %c0_i32_1 = arith.constant 0 : i32
    return %arg0, %c0_i32, %c0_i32_0 : i32, i32, i32
  }
}

</mosaic_0001>

<bundles_post_ra>
// kernel: tpu_custom_call.1
= control target key start
LH: loop header
LB: loop body
LE: loop exit
PB: predicated region body
PF: predicated region fallthrough
CT: control target
= control target key end

     0   :  { %7 = vsyncpa [#allocation3], 0  ;;  %s968_s0 = inlined_call_operand.hbm [shape: f32[16,128], index: 0, kind: input, shape index: {}]   ;;  %s969_s1 = inlined_call_operand.hbm [shape: f32[16,128], index: 1, kind: input, shape index: {}]   ;;  %s970_s2 = inlined_call_operand.hbm [shape: f32[2,2,128], index: 2, kind: output, shape index: {}]  }
   0x1   :  { %9 = vsyncpa [#allocation3 + $0x1], 0 }
   0x2   :  { %10 = vsyncpa [#allocation6], 0 }
   0x3   :  { %12 = vsyncpa [#allocation6 + $0x1], 0 }
   0x4   :  { %13 = vsyncpa [#allocation4], 0 }
   0x5   :  { %15 = vsyncpa [#allocation4 + $0x1], 0  ;;  %s758_s9 = smov 0   ;;  %s760_s10 = smov 0  }
   0x6   :  { %s762_s11 = smov 0   ;;  %s764_s12 = smov 0  }
   0x7   :  { %s766_s13 = smov 0   ;;  %s768_s14 = smov 0  }
   0x8   :  { %s770_s15 = smov 0   ;;  %s772_s16 = smov 0  }
   0x9 LB: > { %s453_s17 = sadd.s32 4294967295, %s736_s16   ;;  %s454_s18 = sadd.s32 4294967294, %s736_s16   ;;  %s736_s16 = sphi %s772_s16, %s21_s16   ;;  %s732_s15 = sphi %s770_s15, %s983_s15   ;;  %s728_s14 = sphi %s768_s14, %s982_s14   ;;  %s724_s13 = sphi %s766_s13, %s958_s13   ;;  %s720_s12 = sphi %s764_s12, %s981_s12   ;;  %s716_s11 = sphi %s762_s11, %s980_s11   ;;  %s712_s10 = sphi %s760_s10, %s979_s10   ;;  %s708_s9 = sphi %s758_s9, %s978_s9  }
   0xa   : > { %s33_s19 = sadd.s32 1, %s732_s15  ;;  %p705_p1 = scmp.ne.s32.totalorder %s724_s13, 0 }
   0xb   : > { %p35_p0 = scmp.ge.s32.totalorder %s33_s19, 2  ;;  %p54_p2 = scmp.eq.s32.totalorder %s736_s16, 0 }
   0xc   : > { %p59_p3 = scmp.ne.s32.totalorder %s724_s13, %s720_s12  ;;  %p60_p5 = scmp.eq.s32.totalorder %s453_s17, 0 }
   0xd   : > { %s985_s19 = smov (%p35_p0, %s33_s19), 0  ;;  %p804_p4 = por %p705_p1, %p54_p2 }
   0xe   : > { %p808_p6 = por %p60_p5, %p59_p3  ;;  %s101_s22 = ssub.s32 %s732_s15, %s985_s19 }
   0xf   : > { %p102_p7 = scmp.eq.s32.totalorder %s101_s22, 0  ;;  %s104_s23 = sadd.s32 1, %s716_s11 }
  0x10   : > { %p114_p8 = scmp.ne.s32.totalorder %s716_s11, %s712_s10  ;;  %p115_p9 = scmp.eq.s32.totalorder %s453_s17, 1 }
  0x11   : > { %s816_s24 = scalar_select %p102_p7, %s716_s11, %s104_s23  }
  0x12   : > { %p120_p10 = scmp.ne.s32.totalorder %s712_s10, %s708_s9  ;;  %p121_p11 = scmp.eq.s32.totalorder %s454_s18, 1 }
  0x13   : > { %p822_p12 = por %p115_p9, %p114_p8  ;;  %p456_p13 = scmp.ge.s32.totalorder %s736_s16, 2 }
  0x14   : > { %p827_p0 = por %p121_p11, %p120_p10  ;;  %p492_p1 = scmp.lt.s32.totalorder %s736_s16, 2 }
  0x15   : > { %s154_s29 = sshll.u32 %s968_s0, 4  ;;  %s738_s30 = smov [#allocation2]   ;;  %s155_s29 = int_to_ptr.hbm [resolvable:$true] %s154_s29 }
  0x16   : > { %s156_s3 = sshll.u32 %s738_s30, 4  ;;  %p837_p2 = pnand %p492_p1, %p804_p4  ;;  %s157_s3 = int_to_ptr.vmem [resolvable:$true] %s156_s3 }
  0x17   : > { %p463_p3 = scmp.ge.s32.totalorder %s736_s16, 1  ;;  %p189_p5 = scmp.lt.s32.totalorder %s736_s16, 3 }
  0x18   : > { %s569_s5 = sshra.s32 %s155_s29, 4  ;;  %p573_p8 = pneg %p837_p2  ;;  %s570_s5 = int_to_ptr.hbm [resolvable:$true] %s569_s5 }
  0x19   : > { %s571_s6 = scalar_lea.hbm %s570_s5, 16  ;;  %s576_s12 = scalar_lea.hbm %s968_s0, 16 }
  0x1a   : > { %p572_p7 = scmp.ne.s32.totalorder %s570_s5, %s571_s6  ;;  %p578_p4 = scmp.lt.s32.totalorder %s576_s12, %s571_s6 }
  0x1c   : > { %p574_p9 = pnand %p573_p8, %p572_p7 }
  0x1e   : > { %p575_p10 = pneg %p574_p9 }
  0x20   : > { %p580_p11 = pnand %p578_p4, %p575_p10 }
  0x22   : > { %583 = shalt.err (!%p580_p11)
}
  0x23   : > { %s739_s17 = smov 128   ;;  %s740_s18 = smov 8  }
  0x24   : > { %484 = dma.hbm_to_vmem [thread:$0]  (!%p837_p2), %s155_s29, 256, %s157_s3, [#allocation3], %s739_s17, %s739_s17, %s740_s18  }
  0x25   : > { %p857_p1 = pnand %p463_p3, %p189_p5  ;;  %s179_s27 = sshll.u32 %s969_s1, 4  ;;  %s180_s27 = int_to_ptr.hbm [resolvable:$true] %s179_s27 }
  0x26   : > { %s741_s28 = smov [#allocation5]   ;;  %s599_s5 = sshra.s32 %s180_s27, 4  ;;  %s600_s5 = int_to_ptr.hbm [resolvable:$true] %s599_s5 }
  0x27   : > { %s181_s30 = sshll.u32 %s741_s28, 4  ;;  %s601_s6 = scalar_lea.hbm %s600_s5, 16  ;;  %s182_s30 = int_to_ptr.vmem [resolvable:$true] %s181_s30 }
  0x28   : > { %p602_p7 = scmp.ne.s32.totalorder %s600_s5, %s601_s6  ;;  %s606_s7 = scalar_lea.hbm %s969_s1, 16 }
  0x29   : > { %p608_p3 = scmp.lt.s32.totalorder %s606_s7, %s601_s6 }
  0x2a   : > { %p604_p9 = pnand %p602_p7, %p573_p8 }
  0x2c   : > { %p605_p10 = pneg %p604_p9 }
  0x2e   : > { %p610_p5 = pnand %p608_p3, %p605_p10 }
  0x30   : > { %613 = shalt.err (!%p610_p5)
}
  0x31   : > { %487 = dma.hbm_to_vmem [thread:$0]  (!%p837_p2), %s180_s27, 256, %s182_s30, [#allocation6], %s739_s17, %s739_s17, %s740_s18  }
  0x32   : > { %193 = sbr.rel (%p857_p1) target bundleno = 147 (0x93), region = 28  ;;  %s195_s8 = sand.u32 (!%p857_p1), 1, %s724_s13  }
  0x33   : > { %s464_s12 = sshll.u32 (!%p857_p1), %s195_s8, 4  ;;  %s196_s22 = scalar_lea.sflag (!%p857_p1), [#allocation3], %s195_s8 }
  0x34   : > { %s875_s23 = scalar_lea.vmem (!%p857_p1), [#allocation2], %s464_s12 }
  0x37   : > { %694 = dma.done.wait (%p808_p6), %s196_s22, 256  }
  0x38   : > { %696 = vsyncadd (%p808_p6), %s196_s22, 4294967040  ;;  %s206_s28 = scalar_lea.sflag [#allocation6], %s195_s8  ;;  %s881_s5 = scalar_lea.vmem [#allocation5], %s464_s12 }
  0x39   : > { %698 = dma.done.wait (%p808_p6), %s206_s28, 256  }
  0x3a   : > { %700 = vsyncadd (%p808_p6), %s206_s28, 4294967040  ;;  %s233_s4 = sand.u32 1, %s712_s10   ;;  %s889_s17 = sshll.u32 %s728_s14, 11  ;;  %v742_v0 = vmov 0.0  }
  0x3b   : > { %s466_s18 = sshll.u32 %s233_s4, 1  ;;  %s251_s20 = sadd.s32 2048, %s889_s17 }
  0x3c   : > { %s894_s27 = scalar_lea.vmem [#allocation7], %s466_s18  ;;  %p897_p2 = scmp.gt.s32.totalorder %s251_s20, 2048 }
  0x3d   : > { %248 = vst [vmem:[%s894_s27] sm:$0x3] %v742_v0 }
  0x3e   : > { %255 = sbr.rel (%p897_p2) target bundleno = 89 (0x59), region = 44 }
  0x43   : > { %v256_v1 = vld [vmem:[%s875_s23] sm:$0xff]  ;;  %v257_v2 = vld [vmem:[%s875_s23 + $0x8] sm:$0xff] }
  0x44   : > { %v258_v3 = vld [vmem:[%s881_s5] sm:$0xff]  ;;  %v259_v4 = vld [vmem:[%s881_s5 + $0x8] sm:$0xff] }
  0x45   : > { %v261_v5 = vmul.f32 %v258_v3, %v256_v1  ;;  %v273_v6 = vadd.f32 %v258_v3, %v256_v1  ;;  %v262_v7 = vmul.f32 %v259_v4, %v257_v2  ;;  %v274_v8 = vadd.f32 %v259_v4, %v257_v2  ;;  %v260_v21 = vld [vmem:[%s894_s27] sm:$0x1]  ;;  %v272_v22 = vld [vmem:[%s894_s27 + $0x1] sm:$0x1] }
  0x47   : > { %v263_v9 = vadd.f32 %v262_v7, %v261_v5  ;;  %v275_v10 = vadd.f32 %v274_v8, %v273_v6 }
  0x49   : > { %v264_v11 = vrot.slane %v263_v9, 4  ;;  %v276_v12 = vrot.slane %v275_v10, 4 }
  0x4b   : > { %v265_v13 = vadd.f32 %v264_v11, %v263_v9  ;;  %v277_v14 = vadd.f32 %v276_v12, %v275_v10 }
  0x4d   : > { %v266_v15 = vrot.slane %v265_v13, 2  ;;  %v278_v16 = vrot.slane %v277_v14, 2 }
  0x4f   : > { %v267_v17 = vadd.f32 %v266_v15, %v265_v13  ;;  %v279_v18 = vadd.f32 %v278_v16, %v277_v14 }
  0x51   : > { %v268_v19 = vrot.slane %v267_v17, 1  ;;  %v280_v20 = vrot.slane %v279_v18, 1 }
  0x53   : > { %v269_v23 = vadd.f32 %v268_v19, %v267_v17  ;;  %v281_v24 = vadd.f32 %v280_v20, %v279_v18 }
  0x55   : > { %v270_v25 = vadd.f32 %v269_v23, %v260_v21  ;;  %v282_v26 = vadd.f32 %v281_v24, %v272_v22 }
  0x57   : > { %271 = vst [vmem:[%s894_s27] sm:$0x1] %v270_v25 }
  0x58   : > { %283 = vst [vmem:[%s894_s27 + $0x1] sm:$0x1] %v282_v26 }
  0x59 PF: > { %p284_p6 = scmp.lt.s32.totalorder %s889_s17, 2048 }
  0x5b   : > { %p286_p8 = pnand %p897_p2, %p284_p6 }
  0x5d   : > { %289 = sbr.rel (%p286_p8) target bundleno = 132 (0x84), region = 48 }
  0x62   : > { %v290_v27 = vlaneseq  ;;  %v297_v29 = vstv %s889_s17  ;;  %v304_v37 = vld [vmem:[%s875_s23] sm:$0xff]  ;;  %v305_v40 = vld [vmem:[%s875_s23 + $0x8] sm:$0xff] }
  0x63   : > { %v308_v38 = vld [vmem:[%s881_s5] sm:$0xff]  ;;  %v309_v41 = vld [vmem:[%s881_s5 + $0x8] sm:$0xff] }
  0x64   : > { %v291_v28 = vshrl.u32 %v290_v27, 7  ;;  %v294_v31 = vand.u32 127, %v290_v27  ;;  %v312_v62 = vld [vmem:[%s894_s27] sm:$0x1]  ;;  %v324_v63 = vld [vmem:[%s894_s27 + $0x1] sm:$0x1] }
  0x66   : > { %v292_v30 = vadd.s32 8, %v291_v28  ;;  %v295_v32 = vmul.u32 128, %v291_v28 }
  0x68   : > { %v296_v33 = vmul.u32 128, %v292_v30  ;;  %v298_v34 = vadd.s32 %v297_v29, %v295_v32 }
  0x6a   : > { %v299_v35 = vadd.s32 %v297_v29, %v296_v33  ;;  %v300_v36 = vadd.s32 %v298_v34, %v294_v31 }
  0x6c   : > { %v301_v39 = vadd.s32 %v299_v35, %v294_v31  ;;  %vm302_vm0 = vcmp.lt.s32.totalorder %v300_v36, 2048 }
  0x6d   : > { %v306_v42 = vsel %vm302_vm0, %v304_v37, 0.0  ;;  %v310_v43 = vsel %vm302_vm0, %v308_v38, 0.0 }
  0x6e   : > { %vm303_vm1 = vcmp.lt.s32.totalorder %v301_v39, 2048  ;;  %v313_v44 = vmul.f32 %v310_v43, %v306_v42  ;;  %v325_v45 = vadd.f32 %v310_v43, %v306_v42 }
  0x6f   : > { %v307_v46 = vsel %vm303_vm1, %v305_v40, 0.0  ;;  %v311_v47 = vsel %vm303_vm1, %v309_v41, 0.0 }
  0x70   : > { %v314_v48 = vmul.f32 %v311_v47, %v307_v46  ;;  %v326_v49 = vadd.f32 %v311_v47, %v307_v46 }
  0x72   : > { %v315_v50 = vadd.f32 %v314_v48, %v313_v44  ;;  %v327_v51 = vadd.f32 %v326_v49, %v325_v45 }
  0x74   : > { %v316_v52 = vrot.slane %v315_v50, 4  ;;  %v328_v53 = vrot.slane %v327_v51, 4 }
  0x76   : > { %v317_v54 = vadd.f32 %v316_v52, %v315_v50  ;;  %v329_v55 = vadd.f32 %v328_v53, %v327_v51 }
  0x78   : > { %v318_v56 = vrot.slane %v317_v54, 2  ;;  %v330_v57 = vrot.slane %v329_v55, 2 }
  0x7a   : > { %v319_v58 = vadd.f32 %v318_v56, %v317_v54  ;;  %v331_v59 = vadd.f32 %v330_v57, %v329_v55 }
  0x7c   : > { %v320_v60 = vrot.slane %v319_v58, 1  ;;  %v332_v61 = vrot.slane %v331_v59, 1 }
  0x7e   : > { %v321_v0 = vadd.f32 %v320_v60, %v319_v58  ;;  %v333_v1 = vadd.f32 %v332_v61, %v331_v59 }
  0x80   : > { %v322_v2 = vadd.f32 %v321_v0, %v312_v62  ;;  %v334_v3 = vadd.f32 %v333_v1, %v324_v63 }
  0x82   : > { %323 = vst [vmem:[%s894_s27] sm:$0x1] %v322_v2 }
  0x83   : > { %335 = vst [vmem:[%s894_s27 + $0x1] sm:$0x1] %v334_v3 }
  0x84 PF: > { %s470_s21 = sshll.u32 %s728_s14, 1  ;;  %s349_s7 = sshll.u32 %s894_s27, 4  ;;  %s350_s7 = int_to_ptr.vmem [resolvable:$true] %s349_s7 }
  0x85   : > { %s347_s3 = scalar_lea.hbm %s970_s2, %s470_s21  ;;  %s337_s12 = scalar_lea.sflag [#allocation4], %s233_s4 }
  0x86   : > { %s351_s8 = sshll.u32 %s347_s3, 4  ;;  %s649_s14 = scalar_lea.hbm %s970_s2, 4  ;;  %s352_s8 = int_to_ptr.hbm [resolvable:$true] %s351_s8 }
  0x87   : > { %s643_s22 = sshra.s32 %s352_s8, 4  ;;  %s644_s22 = int_to_ptr.hbm [resolvable:$true] %s643_s22 }
  0x88   : > { %s645_s23 = scalar_lea.hbm %s644_s22, 2  ;;  %p650_p7 = scmp.lt.s32.totalorder %s644_s22, %s970_s2 }
  0x89   : > { %p646_p4 = scmp.ne.s32.totalorder %s644_s22, %s645_s23  ;;  %p651_p9 = scmp.lt.s32.totalorder %s649_s14, %s645_s23 }
  0x8b   : > { %p647_p11 = pnand %p646_p4, %p822_p12  ;;  %p652_p10 = por %p651_p9, %p650_p7 }
  0x8d   : > { %p648_p1 = pneg %p647_p11 }
  0x8f   : > { %p653_p3 = pnand %p652_p10, %p648_p1 }
  0x91   : > { %656 = shalt.err (!%p653_p3)
}
  0x92   : > { %479 = dma.vmem_to_hbm [thread:$0]  (%p822_p12), %s350_s7, 32, %s352_s8, %s337_s12  }
  0x93 PF: > { %s363_s4 = sand.u32 1, %s708_s9   ;;  %p489_p5 = pnand %p456_p13, %p827_p0 }
  0x94   : > { %s364_s20 = scalar_lea.sflag [#allocation4], %s363_s4 }
  0x95   : > { %p490_p2 = pneg %p489_p5 }
  0x97   : > { %702 = dma.done.wait (%p490_p2), %s364_s20, 32  }
  0x98   : > { %704 = vsyncadd (%p490_p2), %s364_s20, 4294967264  ;;  %s21_s16 = sadd.s32 1, %s736_s16   ;;  %s978_s9 = smov %s712_s10 }
  0x99   : > { %p18_p6 = scmp.ge.s32.totalorder %s21_s16, 4   ;;  %s979_s10 = smov %s716_s11 }
  0x9a   : > { %s980_s11 = smov %s816_s24  ;;  %s981_s12 = smov %s724_s13 }
  0x9b   : > { %s958_s13 = smov 0   ;;  %s982_s14 = smov %s732_s15 }
  0x9c   : > { %s983_s15 = smov %s985_s19  ;;  %20 = sbr.rel (!%p18_p6) target bundleno = 9 (0x9), region = 98 }
  0xa1   :  { %370 = vsyncpa [#allocation3], 1 }
  0xa2   :  { %372 = vsyncpa [#allocation3 + $0x1], 1 }
  0xa3   :  { %373 = vsyncpa [#allocation6], 1 }
  0xa4   :  { %375 = vsyncpa [#allocation6 + $0x1], 1 }
  0xa5   :  { %376 = vsyncpa [#allocation4], 1 }
  0xa6   :  { %378 = vsyncpa [#allocation4 + $0x1], 1 }

</bundles_post_ra>
